<compile_context>
chip_gen: v7x
topology: tpu7x:2x2x1
jax: 0.10.0
libtpu: 0.0.40
codegen_flags: <defaults>
</compile_context>

<pallas_src>
import functools
import math

import jax
import jax.numpy as jnp
from jax.experimental import pallas as pl
from jax.experimental.pallas import tpu as pltpu

_LANE_CANDIDATES = (8192, 4096, 2048, 1024, 512, 256, 128)
_MAX_LANE_TILE = 8192

_JNP_OPS = {
    "add": jnp.add,
    "subtract": jnp.subtract,
    "multiply": jnp.multiply,
    "divide": jnp.divide,
}


# --------------------------------------------------------------------------
# Kernel body (dtype cast happens here, in VMEM, not in the wrapper)
# --------------------------------------------------------------------------
def _binary_kernel(a_ref, b_ref, o_ref, *, op_name, compute_dtype):
    a = a_ref[...].astype(compute_dtype)
    b = b_ref[...].astype(compute_dtype)
    if op_name == "add":
        o = a + b
    elif op_name == "subtract":
        o = a - b
    elif op_name == "multiply":
        o = a * b
    elif op_name == "divide":
        o = a / b
    else:
        raise ValueError(f"unsupported op: {op_name}")
    o_ref[...] = o.astype(o_ref.dtype)


# --------------------------------------------------------------------------
# Hardware-generation helpers
# --------------------------------------------------------------------------
@functools.lru_cache(maxsize=1)
def _device_kind():
    try:
        return jax.devices()[0].device_kind.lower()
    except Exception:
        return ""


def _per_input_target_elems():
    """Per-input tile size in elements, sized per TPU generation."""
    kind = _device_kind()
    if "v6" in kind or "7" in kind:          # v6e / v7x: ~4 MiB f32 per input
        return 1024 * 1024
    return 512 * 1024                        # v5e & unknown: ~2 MiB f32


def _dim_semantics(grid):
    """All-parallel semantics; on v7x split the leading axis across both TCs."""
    sems = [pltpu.PARALLEL] * len(grid)
    kind = _device_kind()
    if grid and grid[0] >= 2 and "7" in kind and hasattr(pltpu, "CORE_PARALLEL"):
        sems[0] = pltpu.CORE_PARALLEL
    return tuple(sems)


# --------------------------------------------------------------------------
# Tiling helpers
# --------------------------------------------------------------------------
def _pick_lane_width(n):
    """Widest lane-dense (multiple of 128) last dim that divides n exactly."""
    for c in _LANE_CANDIDATES:
        if n % c == 0:
            return c
    return None


def _round_up(x, m):
    return ((x + m - 1) // m) * m


def _tile_last2(m_dim, l_dim, target_elems):
    """Tile sizes for the last two dims; always (8,128)-legal."""
    t_l = l_dim if l_dim <= _MAX_LANE_TILE else _MAX_LANE_TILE   # full or x128
    budget = max(1, target_elems // t_l)
    if m_dim <= budget:
        t_m = m_dim                                              # full extent
    else:
        t_m = max(8, (budget // 32) * 32)                        # multiple of 8
    return t_m, t_l


def _merge_broadcast_dims(a_shape, b_shape, out_shape):
    """Align ranks, drop size-1 output dims, merge adjacent dims that share the
    same (a_broadcast, b_broadcast) pattern. All resulting reshapes are free."""
    r = len(out_shape)
    a = (1,) * (r - len(a_shape)) + tuple(a_shape)
    b = (1,) * (r - len(b_shape)) + tuple(b_shape)
    dims = []
    for od, ad, bd in zip(out_shape, a, b):
        if od == 1:
            continue
        dims.append([od, ad == 1, bd == 1])
    if not dims:
        return (1,), (1,), (1,)
    merged = [dims[0]]
    for od, ab, bb in dims[1:]:
        if merged[-1][1] == ab and merged[-1][2] == bb:
            merged[-1][0] *= od
        else:
            merged.append([od, ab, bb])
    out_m = tuple(m[0] for m in merged)
    a_m = tuple(1 if m[1] else m[0] for m in merged)
    b_m = tuple(1 if m[2] else m[0] for m in merged)
    return a_m, b_m, out_m


# --------------------------------------------------------------------------
# Generic N-D pallas_call (broadcasting via index_map, in-kernel casts)
# --------------------------------------------------------------------------
def _pallas_call_nd(a, b, out_shape_nd, out_dtype, op_name, target_elems):
    r = len(out_shape_nd)
    assert r >= 2 and a.ndim == r and b.ndim == r
    m_dim, l_dim = out_shape_nd[-2], out_shape_nd[-1]
    t_m, t_l = _tile_last2(m_dim, l_dim, target_elems)
    block_out = (1,) * (r - 2) + (t_m, t_l)
    grid = tuple(out_shape_nd[: r - 2]) + (pl.cdiv(m_dim, t_m), pl.cdiv(l_dim, t_l))

    def make_in_spec(shape):
        flags = tuple(s == 1 for s in shape)
        blk = tuple(1 if f else bo for f, bo in zip(flags, block_out))

        def imap(*idx, _flags=flags):
            return tuple(0 if f else i for f, i in zip(_flags, idx))

        return pl.BlockSpec(blk, imap)

    in_specs = [make_in_spec(a.shape), make_in_spec(b.shape)]
    out_spec = pl.BlockSpec(block_out, lambda *idx: idx)

    a_it = jnp.dtype(a.dtype).itemsize
    b_it = jnp.dtype(b.dtype).itemsize
    o_it = jnp.dtype(out_dtype).itemsize
    n_out = math.prod(out_shape_nd)
    bytes_per_step = t_m * t_l * (a_it + b_it + o_it)
    vmem_limit = max(32 << 20, min(2 * bytes_per_step + (8 << 20), 48 << 20))
    cost = pl.CostEstimate(
        flops=n_out,
        transcendentals=0,
        bytes_accessed=a.size * a_it + b.size * b_it + n_out * o_it,
    )
    kernel = functools.partial(
        _binary_kernel, op_name=op_name, compute_dtype=jnp.dtype(out_dtype)
    )

    def run(dim_sems):
        return pl.pallas_call(
            kernel,
            out_shape=jax.ShapeDtypeStruct(out_shape_nd, out_dtype),
            grid_spec=pltpu.PrefetchScalarGridSpec(
                num_scalar_prefetch=0,
                grid=grid,
                in_specs=in_specs,
                out_specs=out_spec,
            ),
            compiler_params=pltpu.CompilerParams(
                dimension_semantics=dim_sems,
                vmem_limit_bytes=vmem_limit,
            ),
            cost_estimate=cost,
        )(a, b)

    sems = _dim_semantics(grid)
    base = tuple([pltpu.PARALLEL] * len(grid))
    if sems == base:
        return run(sems)
    try:
        return run(sems)               # CORE_PARALLEL attempt (v7x)
    except Exception:
        return run(base)               # safe fallback


# --------------------------------------------------------------------------
# Same-shape (no broadcasting) paths
# --------------------------------------------------------------------------
def _ragged_flat(a, b, n, out_shape, out_dtype, op_name, target_elems):
    """Flat length not a multiple of 128: 1-D partial-edge blocks (zero extra
    HBM passes), with a pad-based 2-D fallback if 1-D lowering is rejected."""
    a1 = a.reshape(-1)
    b1 = b.reshape(-1)
    if n < 1024:
        return _JNP_OPS[op_name](a1, b1).astype(out_dtype).reshape(out_shape)

    blk = min(_round_up(target_elems, 128), _round_up(n, 128))
    a_it = jnp.dtype(a.dtype).itemsize
    b_it = jnp.dtype(b.dtype).itemsize
    o_it = jnp.dtype(out_dtype).itemsize
    vmem_limit = max(32 << 20, min(2 * blk * (a_it + b_it + o_it) + (8 << 20), 48 << 20))
    kernel = functools.partial(
        _binary_kernel, op_name=op_name, compute_dtype=jnp.dtype(out_dtype)
    )
    try:
        out1 = pl.pallas_call(
            kernel,
            out_shape=jax.ShapeDtypeStruct((n,), out_dtype),
            grid_spec=pltpu.PrefetchScalarGridSpec(
                num_scalar_prefetch=0,
                grid=(pl.cdiv(n, blk),),
                in_specs=[
                    pl.BlockSpec((blk,), lambda i: (i,)),
                    pl.BlockSpec((blk,), lambda i: (i,)),
                ],
                out_specs=pl.BlockSpec((blk,), lambda i: (i,)),
            ),
            compiler_params=pltpu.CompilerParams(
                dimension_semantics=(pltpu.PARALLEL,),
                vmem_limit_bytes=vmem_limit,
            ),
            cost_estimate=pl.CostEstimate(
                flops=n, transcendentals=0,
                bytes_accessed=n * (a_it + b_it + o_it),
            ),
        )(a1, b1)
        return out1.reshape(out_shape)
    except Exception:
        # Fallback: pad to a lane-dense slab, trim afterwards (correct, slower).
        lane = 1024
        pad = (-n) % lane
        a_p = jnp.concatenate([a1, jnp.zeros((pad,), a1.dtype)])
        b_p = jnp.concatenate([b1, jnp.ones((pad,), b1.dtype)])
        rows = (n + pad) // lane
        out2 = _pallas_call_nd(
            a_p.reshape(rows, lane), b_p.reshape(rows, lane),
            (rows, lane), out_dtype, op_name, target_elems,
        )
        return out2.reshape(-1)[:n].reshape(out_shape)


def _flat_same_shape(a, b, n, out_shape, out_dtype, op_name, target_elems):
    lane = _pick_lane_width(n)
    if lane is None:
        return _ragged_flat(a, b, n, out_shape, out_dtype, op_name, target_elems)
    rows = n // lane
    out2 = _pallas_call_nd(
        a.reshape(rows, lane), b.reshape(rows, lane),
        (rows, lane), out_dtype, op_name, target_elems,
    )
    return out2.reshape(out_shape)


# --------------------------------------------------------------------------
# Broadcasting path (no materialization of the small operand)
# --------------------------------------------------------------------------
def _broadcast_forward(a, b, out_shape, out_dtype, op_name, target_elems):
    a_m, b_m, out_m = _merge_broadcast_dims(a.shape, b.shape, out_shape)
    a = a.reshape(a_m)
    b = b.reshape(b_m)

    if a_m == out_m and b_m == out_m:
        # shapes only differed by size-1 dims -> use the slab fast path
        return _flat_same_shape(a, b, math.prod(out_m), out_shape, out_dtype,
                                op_name, target_elems)

    if len(out_m) == 1:
        # one operand is effectively a scalar: slab for the big one, (1,1) block
        # (index pinned to (0,0)) for the small one.
        n = out_m[0]
        lane = _pick_lane_width(n)
        if lane is not None:
            rows = n // lane
            shape2 = (rows, lane)
        else:
            rows, lane = 1, n
            shape2 = (1, n)

        def to2(x):
            return x.reshape(rows, lane) if x.size == n else x.reshape(1, 1)

        out2 = _pallas_call_nd(to2(a), to2(b), shape2, out_dtype, op_name,
                               target_elems)
        return out2.reshape(out_shape)

    out_nd = _pallas_call_nd(a, b, out_m, out_dtype, op_name, target_elems)
    return out_nd.reshape(out_shape)


# --------------------------------------------------------------------------
# Public entry point (== Model(op).forward)
# --------------------------------------------------------------------------
def elementwise_binary(input1, input2, op_name="add", min_pallas_elems=65536):
    """Pallas equivalent of Model(op).forward(input1, input2)."""
    input1 = jnp.asarray(input1)
    input2 = jnp.asarray(input2)
    out_shape = jnp.broadcast_shapes(input1.shape, input2.shape)
    # TODO(synk): jnp.result_type may differ from torch promotion for some
    # mixed int/float combos (and 64-bit inputs demote with x64 disabled).
    out_dtype = jnp.result_type(input1.dtype, input2.dtype)
    if op_name == "divide" and not jnp.issubdtype(out_dtype, jnp.inexact):
        out_dtype = jnp.float32

    n = math.prod(out_shape)
    if n == 0:
        return jnp.zeros(out_shape, out_dtype)
    if n < min_pallas_elems:
        # Tiny tensors: per-call Pallas overhead dominates -> plain XLA op.
        return _JNP_OPS[op_name](input1, input2).astype(out_dtype)

    target_elems = _per_input_target_elems()
    if input1.shape == input2.shape:
        return _flat_same_shape(input1, input2, n, out_shape, out_dtype,
                                op_name, target_elems)
    return _broadcast_forward(input1, input2, out_shape, out_dtype,
                              op_name, target_elems)


class Model:
    """Pallas analogue of the PyTorch Model(op) module."""

    def __init__(self, op_name):
        self.op_name = op_name

    def __call__(self, input1, input2, **kwargs):
        return elementwise_binary(input1, input2, self.op_name, **kwargs)

    forward = __call__


# --------------------------------------------------------------------------
if __name__ == "__main__":
    key = jax.random.PRNGKey(0)
    k1, k2, k3, k4 = jax.random.split(key, 4)
    # small NCHW-shaped inputs consistent with the test module's usage
    x1 = jax.random.normal(k1, (2, 4, 16, 16), dtype=jnp.float32)
    x2 = jax.random.normal(k2, (2, 4, 16, 16), dtype=jnp.float32) + 2.0
    x3 = jax.random.normal(k3, (1, 4, 1, 1), dtype=jnp.float32)  # per-channel

    failures = []

    def check(name, out, ref, rtol=1e-6, atol=1e-6):
        out = jax.block_until_ready(out)
        if not bool(jnp.allclose(out, ref, rtol=rtol, atol=atol)):
            failures.append(name)
            print(f"MISMATCH: {name}")

    # Small shapes, forced through the Pallas path so the kernel really runs.
    for op_name, ref_fn in [("add", jnp.add), ("subtract", jnp.subtract),
                            ("multiply", jnp.multiply), ("divide", jnp.divide)]:
        model = Model(op_name)
        check(op_name, model(x1, x2, min_pallas_elems=0), ref_fn(x1, x2))

    # Broadcast operand handled via index_map (no HBM materialization).
    check("broadcast_multiply",
          elementwise_binary(x1, x3, "multiply", min_pallas_elems=0), x1 * x3)

    # Mixed dtype: the cast to f32 happens inside the kernel.
    x1_bf = x1.astype(jnp.bfloat16)
    check("mixed_dtype_add",
          elementwise_binary(x1_bf, x2, "add", min_pallas_elems=0),
          jnp.add(x1_bf, x2))

    # Ragged flat length (not a multiple of 128).
    r1 = jax.random.normal(k4, (3, 5, 7, 11), dtype=jnp.float32)
    r2 = jax.random.normal(k1, (3, 5, 7, 11), dtype=jnp.float32) + 2.0
    check("ragged_divide",
          elementwise_binary(r1, r2, "divide", min_pallas_elems=0), r1 / r2)

    # Moderately large slab exercising the default tiled path.
    y1 = jax.random.normal(k2, (4, 8, 128, 256), dtype=jnp.float32)
    y2 = jax.random.normal(k3, (4, 8, 128, 256), dtype=jnp.float32) + 2.0
    check("large_add", elementwise_binary(y1, y2, "add"), y1 + y2)

    if not failures:
        print("KERNEL_OK")
</pallas_src>

<mosaic_0001>
module attributes {stable_mosaic.version = 11 : i64} {
  func.func @_binary_kernel(%arg0: i32, %arg1: i32, %arg2: memref<1x2048xf32, #tpu.memory_space<vmem>>, %arg3: memref<1x2048xf32, #tpu.memory_space<vmem>>, %arg4: memref<1x2048xf32, #tpu.memory_space<vmem>>) attributes {dimension_semantics = [#tpu.dimension_semantics<parallel>, #tpu.dimension_semantics<parallel>], iteration_bounds = array<i64: 1, 1>, scalar_prefetch = 0 : i64, scratch_operands = 0 : i64, tpu.core_type = #tpu.core_type<tc>, window_params = [{transform_indices = @transform_0, window_bounds = array<i64: 1, 2048>}, {transform_indices = @transform_1, window_bounds = array<i64: 1, 2048>}, {transform_indices = @transform_2, window_bounds = array<i64: 1, 2048>}]} {
    %c0 = arith.constant 0 : index
    %c0_0 = arith.constant 0 : index
    %0 = vector.load %arg2[%c0, %c0_0] : memref<1x2048xf32, #tpu.memory_space<vmem>>, vector<1x2048xf32>
    %c0_1 = arith.constant 0 : index
    %c0_2 = arith.constant 0 : index
    %1 = vector.load %arg3[%c0_1, %c0_2] : memref<1x2048xf32, #tpu.memory_space<vmem>>, vector<1x2048xf32>
    %2 = arith.addf %0, %1 : vector<1x2048xf32>
    %c0_3 = arith.constant 0 : index
    %c0_4 = arith.constant 0 : index
    %3 = vector.load %arg4[%c0_3, %c0_4] : memref<1x2048xf32, #tpu.memory_space<vmem>>, vector<1x2048xf32>
    tpu.vector_store %arg4[%c0_3, %c0_4], %2 {strides = array<i32>} : memref<1x2048xf32, #tpu.memory_space<vmem>>, vector<1x2048xf32>,
    return
  }
  func.func @transform_0(%arg0: i32, %arg1: i32) -> (i32, i32) {
    %c0_i32 = arith.constant 0 : i32
    %c0_i32_0 = arith.constant 0 : i32
    return %c0_i32, %arg1 : i32, i32
  }
  func.func @transform_1(%arg0: i32, %arg1: i32) -> (i32, i32) {
    %c0_i32 = arith.constant 0 : i32
    %c0_i32_0 = arith.constant 0 : i32
    return %c0_i32, %arg1 : i32, i32
  }
  func.func @transform_2(%arg0: i32, %arg1: i32) -> (i32, i32) {
    %c0_i32 = arith.constant 0 : i32
    return %arg0, %arg1 : i32, i32
  }
}

</mosaic_0001>

<bundles_post_ra>
// kernel: tpu_custom_call.1
= control target key start
LH: loop header
LB: loop body
LE: loop exit
PB: predicated region body
PF: predicated region fallthrough
CT: control target
= control target key end

     0   :  { %7 = vsyncpa [#allocation3], 0  ;;  %s189_s0 = inlined_call_operand.hbm [shape: f32[1,2048], index: 0, kind: input, shape index: {}]   ;;  %s190_s1 = inlined_call_operand.hbm [shape: f32[1,2048], index: 1, kind: input, shape index: {}]   ;;  %s191_s2 = inlined_call_operand.hbm [shape: f32[1,2048], index: 2, kind: output, shape index: {}]  }
   0x1   :  { %8 = vsyncpa [#allocation6], 0 }
   0x2   :  { %9 = vsyncpa [#allocation4], 0  ;;  %s135_s9 = smov [#allocation2]   ;;  %s136_s11 = smov [#allocation5]  }
   0x3   :  { %s16_s10 = sshll.u32 %s135_s9, 4  ;;  %s26_s12 = sshll.u32 %s136_s11, 4  ;;  %s17_s10 = int_to_ptr.vmem [resolvable:$true] %s16_s10  ;;  %s27_s12 = int_to_ptr.vmem [resolvable:$true] %s26_s12 }
   0x4   :  { %s63_s15 = scalar_lea.hbm %s189_s0, 256 }
   0x5   :  { %p64_p0 = scmp.ne.s32.totalorder %s189_s0, %s63_s15  ;;  %p67_p1 = scmp.lt.u32.totalorder %s63_s15, %s189_s0 }
   0x7   :  { %p69_p2 = pnand %p67_p1, %p64_p0 }
   0x9   :  { %72 = shalt.err (!%p69_p2)
}
   0xa   :  { %s73_s20 = scalar_lea.vmem %s17_s10, 256  ;;  %p78_p4 = scmp.lt.s32.totalorder %s17_s10, %s17_s10 }
   0xb   :  { %p74_p3 = scmp.ne.s32.totalorder %s17_s10, %s73_s20  ;;  %p79_p5 = scmp.lt.s32.totalorder %s73_s20, %s73_s20 }
   0xd   :  { %p80_p6 = por %p79_p5, %p78_p4 }
   0xf   :  { %p81_p7 = pnand %p80_p6, %p74_p3 }
  0x11   :  { %84 = shalt.err (!%p81_p7)
}
  0x12   :  { %19 = dma.hbm_to_vmem [thread:$0]  %s189_s0, 256, %s17_s10, [#allocation3]  }
  0x13   :  { %s85_s25 = scalar_lea.hbm %s190_s1, 256 }
  0x14   :  { %p86_p8 = scmp.ne.s32.totalorder %s190_s1, %s85_s25  ;;  %p89_p9 = scmp.lt.u32.totalorder %s85_s25, %s190_s1 }
  0x16   :  { %p91_p10 = pnand %p89_p9, %p86_p8 }
  0x18   :  { %94 = shalt.err (!%p91_p10)
}
  0x19   :  { %s95_s30 = scalar_lea.vmem %s27_s12, 256  ;;  %p100_p12 = scmp.lt.s32.totalorder %s27_s12, %s27_s12 }
  0x1a   :  { %p96_p11 = scmp.ne.s32.totalorder %s27_s12, %s95_s30  ;;  %p101_p13 = scmp.lt.s32.totalorder %s95_s30, %s95_s30 }
  0x1c   :  { %p102_p0 = por %p101_p13, %p100_p12 }
  0x1e   :  { %p103_p1 = pnand %p102_p0, %p96_p11 }
  0x20   :  { %106 = shalt.err (!%p103_p1)
}
  0x21   :  { %29 = dma.hbm_to_vmem [thread:$0]  %s190_s1, 256, %s27_s12, [#allocation6]  }
  0x22   :  { %129 = dma.done.wait [#allocation3], 256  }
  0x23   :  { %130 = vsyncadd [#allocation3], 4294967040 }
  0x24   :  { %131 = dma.done.wait [#allocation6], 256  }
  0x25   :  { %132 = vsyncadd [#allocation6], 4294967040  ;;  %s137_s4 = smov [#allocation7]   ;;  %v36_v0 = vld [vmem:[#allocation2] sm:$0xff]  ;;  %v38_v1 = vld [vmem:[#allocation5] sm:$0xff] }
  0x26   :  { %s50_s5 = sshll.u32 %s137_s4, 4  ;;  %v37_v2 = vld [vmem:[#allocation2 + $0x8] sm:$0xff]  ;;  %v40_v3 = vadd.f32 %v38_v1, %v36_v0  ;;  %v39_v4 = vld [vmem:[#allocation5 + $0x8] sm:$0xff]  ;;  %s51_s5 = int_to_ptr.vmem [resolvable:$true] %s50_s5 }
  0x27   :  { %v41_v5 = vadd.f32 %v39_v4, %v37_v2  ;;  %s107_s6 = scalar_lea.vmem %s51_s5, 256  ;;  %p112_p3 = scmp.lt.s32.totalorder %s51_s5, %s51_s5 }
  0x28   :  { %42 = vst [vmem:[#allocation7] sm:$0xff] %v40_v3  ;;  %p108_p2 = scmp.ne.s32.totalorder %s51_s5, %s107_s6  ;;  %p113_p4 = scmp.lt.s32.totalorder %s107_s6, %s107_s6 }
  0x29   :  { %43 = vst [vmem:[#allocation7 + $0x8] sm:$0xff] %v41_v5 }
  0x2a   :  { %p114_p5 = por %p113_p4, %p112_p3 }
  0x2c   :  { %p115_p6 = pnand %p114_p5, %p108_p2 }
  0x2e   :  { %118 = shalt.err (!%p115_p6)
}
  0x2f   :  { %s119_s8 = scalar_lea.hbm %s191_s2, 256 }
  0x30   :  { %p120_p7 = scmp.ne.s32.totalorder %s191_s2, %s119_s8  ;;  %p123_p8 = scmp.lt.u32.totalorder %s119_s8, %s191_s2 }
  0x32   :  { %p125_p9 = pnand %p123_p8, %p120_p7 }
  0x34   :  { %128 = shalt.err (!%p125_p9)
}
  0x35   :  { %53 = dma.vmem_to_hbm [thread:$0]  %s51_s5, 256, %s191_s2, [#allocation4]  }
  0x36   :  { %133 = dma.done.wait [#allocation4], 256  }
  0x37   :  { %134 = vsyncadd [#allocation4], 4294967040 }
  0x38   :  { %57 = vsyncpa [#allocation3], 1 }
  0x39   :  { %58 = vsyncpa [#allocation6], 1 }
  0x3a   :  { %59 = vsyncpa [#allocation4], 1 }

</bundles_post_ra>
